<compile_context>
chip_gen: v7x
topology: tpu7x:2x2x1
jax: 0.10.0
libtpu: 0.0.40
codegen_flags: <defaults>
</compile_context>

<pallas_src>
import jax
import jax.numpy as jnp
from jax.experimental import pallas as pl
from jax.experimental.pallas import tpu as pltpu

EPS = 1e-5
LANE = 128     # pad all feature (lane) dims to one vreg lane width
B_PAD = 8      # pad MLP-stage batch rows to one sublane group


def _vmem_spec():
    # Whole-array block resident in VMEM (shapes here are tiny).
    return pl.BlockSpec(memory_space=pltpu.MemorySpace.VMEM)


# ----------------------------------------------------------------------------
# Fused kernel: conv+ReLU -> GAP -> Linear -> proj MLP -> pred MLP
# ----------------------------------------------------------------------------
def _make_fused_kernel(inv_b):
    """inv_b = 1 / real_batch_size, captured as a compile-time constant."""

    def _mlp(x, w1_ref, b1_ref, g_ref, bt_ref, w2_ref, b2_ref, mask):
        # Linear (bf16 MXU operands, f32 accumulate)
        h = jnp.dot(x.astype(jnp.bfloat16), w1_ref[...],
                    preferred_element_type=jnp.float32) + b1_ref[...]
        # BatchNorm1d, training-mode batch statistics. Padded batch rows are
        # masked out so they do not perturb mean / biased variance.
        mu = jnp.sum(h * mask, axis=0, keepdims=True) * inv_b
        d = (h - mu) * mask
        var = jnp.sum(d * d, axis=0, keepdims=True) * inv_b
        hn = (h - mu) * jax.lax.rsqrt(var + EPS) * g_ref[...] + bt_ref[...]
        hr = jnp.maximum(hn, 0.0)
        return jnp.dot(hr.astype(jnp.bfloat16), w2_ref[...],
                       preferred_element_type=jnp.float32) + b2_ref[...]

    def kernel(patches_ref, pool_ref, mask_ref,
               cw_ref, cb_ref, fw_ref, fb_ref,
               pw1_ref, pb1_ref, pg_ref, pbt_ref, pw2_ref, pb2_ref,
               qw1_ref, qb1_ref, qg_ref, qbt_ref, qw2_ref, qb2_ref,
               out_ref):
        # ---- backbone stem -------------------------------------------------
        # conv3x3 as one im2col matmul (bf16 MXU) + bias + ReLU (f32 VPU)
        conv = jnp.dot(patches_ref[...], cw_ref[...],
                       preferred_element_type=jnp.float32)
        conv = jnp.maximum(conv + cb_ref[...], 0.0)                 # (N, LANE)
        # global average pool as an MXU matmul with the (B_PAD, N) pool matrix
        pooled = jnp.dot(pool_ref[...], conv.astype(jnp.bfloat16),
                         preferred_element_type=jnp.float32)        # (B_PAD, LANE)
        feat = jnp.dot(pooled.astype(jnp.bfloat16), fw_ref[...],
                       preferred_element_type=jnp.float32) + fb_ref[...]

        mask = mask_ref[...]                                        # (B_PAD, 1)
        # ---- projection MLP --------------------------------------------------
        proj = _mlp(feat, pw1_ref, pb1_ref, pg_ref, pbt_ref, pw2_ref, pb2_ref,
                    mask)
        # ---- predictor MLP ---------------------------------------------------
        pred = _mlp(proj, qw1_ref, qb1_ref, qg_ref, qbt_ref, qw2_ref, qb2_ref,
                    mask)
        out_ref[...] = pred

    return kernel


# ----------------------------------------------------------------------------
# Parameter init: real (scaled-down) shapes, zero-padded to lane-dense slabs.
# feature_dim 32 stands in for 2048, hidden 64 for 4096, output 16 for 256.
# ----------------------------------------------------------------------------
def _pad_mat(w, rows, cols):
    out = jnp.zeros((rows, cols), jnp.float32)
    return out.at[: w.shape[0], : w.shape[1]].set(w)


def _pad_vec(v, cols, fill=0.0):
    out = jnp.full((1, cols), fill, jnp.float32)
    return out.at[0, : v.shape[0]].set(v)


def init_params(key, c_in, c_conv, feat_dim, hidden, out_dim):
    ks = jax.random.split(key, 12)
    s = 0.05
    kdim = 9 * c_in
    p = {}
    # conv weight stored as (9*C_in, C_conv) matmul matrix, columns padded to 128
    p["conv_w"] = _pad_mat(s * jax.random.normal(ks[0], (kdim, c_conv)),
                           kdim, LANE).astype(jnp.bfloat16)
    p["conv_b"] = _pad_vec(s * jax.random.normal(ks[1], (c_conv,)), LANE)
    p["feat_w"] = _pad_mat(s * jax.random.normal(ks[2], (c_conv, feat_dim)),
                           LANE, LANE).astype(jnp.bfloat16)
    p["feat_b"] = _pad_vec(s * jax.random.normal(ks[3], (feat_dim,)), LANE)

    def mlp(k0, k1, k2, k3, inp, hid, out):
        return {
            "w1": _pad_mat(s * jax.random.normal(k0, (inp, hid)),
                           LANE, LANE).astype(jnp.bfloat16),
            "b1": _pad_vec(s * jax.random.normal(k1, (hid,)), LANE),
            "gamma": _pad_vec(jnp.ones((hid,), jnp.float32), LANE, fill=1.0),
            "beta": _pad_vec(jnp.zeros((hid,), jnp.float32), LANE),
            "w2": _pad_mat(s * jax.random.normal(k2, (hid, out)),
                           LANE, LANE).astype(jnp.bfloat16),
            "b2": _pad_vec(s * jax.random.normal(k3, (out,)), LANE),
        }

    p["proj"] = mlp(ks[4], ks[5], ks[6], ks[7], feat_dim, hidden, out_dim)
    p["pred"] = mlp(ks[8], ks[9], ks[10], ks[11], out_dim, hidden, out_dim)
    return p


# ----------------------------------------------------------------------------
# OnlineNetwork forward
# ----------------------------------------------------------------------------
def online_network_forward(x_nchw, params, out_dim):
    B, C, H, W = x_nchw.shape
    HW = H * W
    N = B * HW

    # layout: NCHW (PyTorch) -> NHWC so channels sit on the lane axis.
    # im2col for a 3x3 / stride 1 / pad 1 conv (glue, no flops).
    # TODO(synk): at real scale move the 9-tap accumulation in-kernel (grid
    # axis over taps indexing the padded NHWC input) to avoid the 9x-inflated
    # patch matrix in HBM.
    x = jnp.transpose(x_nchw, (0, 2, 3, 1)).astype(jnp.float32)
    xp = jnp.pad(x, ((0, 0), (1, 1), (1, 1), (0, 0)))
    pats = [xp[:, i:i + H, j:j + W, :] for i in range(3) for j in range(3)]
    patches = jnp.stack(pats, axis=3).reshape(N, 9 * C).astype(jnp.bfloat16)

    # pool matrix: pool_mat[b, n] = 1/(H*W) iff pixel n belongs to batch b
    # (rows b >= B are zero -> zero padded-batch rows downstream).
    pix_b = jnp.arange(N) // HW
    pool_mat = ((jnp.arange(B_PAD)[:, None] == pix_b[None, :])
                .astype(jnp.float32) * (1.0 / HW)).astype(jnp.bfloat16)
    # batch-row validity mask for the masked BatchNorm statistics.
    mask = (jnp.arange(B_PAD) < B).astype(jnp.float32).reshape(B_PAD, 1)

    pr, qr = params["proj"], params["pred"]
    args = (patches, pool_mat, mask,
            params["conv_w"], params["conv_b"],
            params["feat_w"], params["feat_b"],
            pr["w1"], pr["b1"], pr["gamma"], pr["beta"], pr["w2"], pr["b2"],
            qr["w1"], qr["b1"], qr["gamma"], qr["beta"], qr["w2"], qr["b2"])

    flops = 2 * (N * (9 * C) * LANE          # conv matmul
                 + B_PAD * N * LANE          # GAP matmul
                 + 5 * B_PAD * LANE * LANE)  # feat linear + 2x2 MLP matmuls
    bytes_accessed = sum(int(a.size) * a.dtype.itemsize for a in args) \
        + B_PAD * LANE * 4
    cost = pl.CostEstimate(flops=flops,
                           transcendentals=2 * B_PAD * LANE,
                           bytes_accessed=bytes_accessed)

    out = pl.pallas_call(
        _make_fused_kernel(1.0 / B),
        out_shape=jax.ShapeDtypeStruct((B_PAD, LANE), jnp.float32),
        in_specs=[_vmem_spec()] * len(args),
        out_specs=_vmem_spec(),
        compiler_params=pltpu.CompilerParams(
            vmem_limit_bytes=32 * 1024 * 1024),
        cost_estimate=cost,
    )(*args)

    # strip batch-row and lane padding
    return out[:B, :out_dim]


if __name__ == "__main__":
    key = jax.random.PRNGKey(0)
    k_x, k_p = jax.random.split(key)

    B, C, H, W = 2, 4, 16, 16
    C_CONV, FEAT, HIDDEN, OUT = 8, 32, 64, 16

    x = jax.random.normal(k_x, (B, C, H, W), jnp.float32)
    params = init_params(k_p, C, C_CONV, FEAT, HIDDEN, OUT)

    out = online_network_forward(x, params, OUT)
    out = jax.block_until_ready(out)

    assert out.shape == (B, OUT) and out.dtype == jnp.float32
    assert bool(jnp.all(jnp.isfinite(out)))
    print("KERNEL_OK")
</pallas_src>

<mosaic_0001>
module attributes {stable_mosaic.version = 11 : i64} {
  func.func @kernel(%arg0: memref<512x36xbf16, #tpu.memory_space<vmem>>, %arg1: memref<8x512xbf16, #tpu.memory_space<vmem>>, %arg2: memref<8x1xf32, #tpu.memory_space<vmem>>, %arg3: memref<36x128xbf16, #tpu.memory_space<vmem>>, %arg4: memref<1x128xf32, #tpu.memory_space<vmem>>, %arg5: memref<128x128xbf16, #tpu.memory_space<vmem>>, %arg6: memref<1x128xf32, #tpu.memory_space<vmem>>, %arg7: memref<128x128xbf16, #tpu.memory_space<vmem>>, %arg8: memref<1x128xf32, #tpu.memory_space<vmem>>, %arg9: memref<1x128xf32, #tpu.memory_space<vmem>>, %arg10: memref<1x128xf32, #tpu.memory_space<vmem>>, %arg11: memref<128x128xbf16, #tpu.memory_space<vmem>>, %arg12: memref<1x128xf32, #tpu.memory_space<vmem>>, %arg13: memref<128x128xbf16, #tpu.memory_space<vmem>>, %arg14: memref<1x128xf32, #tpu.memory_space<vmem>>, %arg15: memref<1x128xf32, #tpu.memory_space<vmem>>, %arg16: memref<1x128xf32, #tpu.memory_space<vmem>>, %arg17: memref<128x128xbf16, #tpu.memory_space<vmem>>, %arg18: memref<1x128xf32, #tpu.memory_space<vmem>>, %arg19: memref<8x128xf32, #tpu.memory_space<vmem>>) attributes {dimension_semantics = [], scalar_prefetch = 0 : i64, scratch_operands = 0 : i64, tpu.core_type = #tpu.core_type<tc>} {
    %c0 = arith.constant 0 : index
    %c0_0 = arith.constant 0 : index
    %0 = vector.load %arg0[%c0, %c0_0] : memref<512x36xbf16, #tpu.memory_space<vmem>>, vector<512x36xbf16>
    %c0_1 = arith.constant 0 : index
    %c0_2 = arith.constant 0 : index
    %1 = vector.load %arg3[%c0_1, %c0_2] : memref<36x128xbf16, #tpu.memory_space<vmem>>, vector<36x128xbf16>
    %cst = arith.constant dense<0.000000e+00> : vector<512x128xf32>
    %2 = tpu.matmul %0, %1, %cst {dimension_numbers = #tpu.dot_dimension_numbers<[1], [0], [0], [1], [0, 0, 1, 1], [], []>} : vector<512x36xbf16>, vector<36x128xbf16>, vector<512x128xf32> -> vector<512x128xf32>
    %c0_3 = arith.constant 0 : index
    %c0_4 = arith.constant 0 : index
    %3 = vector.load %arg4[%c0_3, %c0_4] : memref<1x128xf32, #tpu.memory_space<vmem>>, vector<1x128xf32>
    %4 = vector.broadcast %3 : vector<1x128xf32> to vector<512x128xf32>
    %5 = arith.addf %2, %4 : vector<512x128xf32>
    %cst_5 = arith.constant 0.000000e+00 : f32
    %6 = vector.broadcast %cst_5 : f32 to vector<512x128xf32>
    %7 = arith.maximumf %5, %6 : vector<512x128xf32>
    %c0_6 = arith.constant 0 : index
    %c0_7 = arith.constant 0 : index
    %8 = vector.load %arg1[%c0_6, %c0_7] : memref<8x512xbf16, #tpu.memory_space<vmem>>, vector<8x512xbf16>
    %9 = arith.truncf %7 : vector<512x128xf32> to vector<512x128xbf16>
    %cst_8 = arith.constant dense<0.000000e+00> : vector<8x128xf32>
    %10 = tpu.matmul %8, %9, %cst_8 {dimension_numbers = #tpu.dot_dimension_numbers<[1], [0], [0], [1], [0, 0, 1, 1], [], []>} : vector<8x512xbf16>, vector<512x128xbf16>, vector<8x128xf32> -> vector<8x128xf32>
    %11 = arith.truncf %10 : vector<8x128xf32> to vector<8x128xbf16>
    %c0_9 = arith.constant 0 : index
    %c0_10 = arith.constant 0 : index
    %12 = vector.load %arg5[%c0_9, %c0_10] : memref<128x128xbf16, #tpu.memory_space<vmem>>, vector<128x128xbf16>
    %cst_11 = arith.constant dense<0.000000e+00> : vector<8x128xf32>
    %13 = tpu.matmul %11, %12, %cst_11 {dimension_numbers = #tpu.dot_dimension_numbers<[1], [0], [0], [1], [0, 0, 1, 1], [], []>} : vector<8x128xbf16>, vector<128x128xbf16>, vector<8x128xf32> -> vector<8x128xf32>
    %c0_12 = arith.constant 0 : index
    %c0_13 = arith.constant 0 : index
    %14 = vector.load %arg6[%c0_12, %c0_13] : memref<1x128xf32, #tpu.memory_space<vmem>>, vector<1x128xf32>
    %15 = vector.broadcast %14 : vector<1x128xf32> to vector<8x128xf32>
    %16 = arith.addf %13, %15 : vector<8x128xf32>
    %c0_14 = arith.constant 0 : index
    %c0_15 = arith.constant 0 : index
    %17 = vector.load %arg2[%c0_14, %c0_15] : memref<8x1xf32, #tpu.memory_space<vmem>>, vector<8x1xf32>
    %18 = arith.truncf %16 : vector<8x128xf32> to vector<8x128xbf16>
    %c0_16 = arith.constant 0 : index
    %c0_17 = arith.constant 0 : index
    %19 = vector.load %arg7[%c0_16, %c0_17] : memref<128x128xbf16, #tpu.memory_space<vmem>>, vector<128x128xbf16>
    %cst_18 = arith.constant dense<0.000000e+00> : vector<8x128xf32>
    %20 = tpu.matmul %18, %19, %cst_18 {dimension_numbers = #tpu.dot_dimension_numbers<[1], [0], [0], [1], [0, 0, 1, 1], [], []>} : vector<8x128xbf16>, vector<128x128xbf16>, vector<8x128xf32> -> vector<8x128xf32>
    %c0_19 = arith.constant 0 : index
    %c0_20 = arith.constant 0 : index
    %21 = vector.load %arg8[%c0_19, %c0_20] : memref<1x128xf32, #tpu.memory_space<vmem>>, vector<1x128xf32>
    %22 = vector.broadcast %21 : vector<1x128xf32> to vector<8x128xf32>
    %23 = arith.addf %20, %22 : vector<8x128xf32>
    %24 = vector.broadcast %17 : vector<8x1xf32> to vector<8x128xf32>
    %25 = arith.mulf %23, %24 : vector<8x128xf32>
    %cst_21 = arith.constant dense<0.000000e+00> : vector<128xf32>
    %26 = vector.multi_reduction <add>, %25, %cst_21 [0] : vector<8x128xf32> to vector<128xf32>
    %27 = vector.shape_cast %26 : vector<128xf32> to vector<1x128xf32>
    %cst_22 = arith.constant 5.000000e-01 : f32
    %28 = vector.broadcast %cst_22 : f32 to vector<1x128xf32>
    %29 = arith.mulf %27, %28 : vector<1x128xf32>
    %30 = vector.broadcast %29 : vector<1x128xf32> to vector<8x128xf32>
    %31 = arith.subf %23, %30 : vector<8x128xf32>
    %32 = vector.broadcast %17 : vector<8x1xf32> to vector<8x128xf32>
    %33 = arith.mulf %31, %32 : vector<8x128xf32>
    %34 = arith.mulf %33, %33 : vector<8x128xf32>
    %cst_23 = arith.constant dense<0.000000e+00> : vector<128xf32>
    %35 = vector.multi_reduction <add>, %34, %cst_23 [0] : vector<8x128xf32> to vector<128xf32>
    %36 = vector.shape_cast %35 : vector<128xf32> to vector<1x128xf32>
    %cst_24 = arith.constant 5.000000e-01 : f32
    %37 = vector.broadcast %cst_24 : f32 to vector<1x128xf32>
    %38 = arith.mulf %36, %37 : vector<1x128xf32>
    %39 = vector.broadcast %29 : vector<1x128xf32> to vector<8x128xf32>
    %40 = arith.subf %23, %39 : vector<8x128xf32>
    %cst_25 = arith.constant 9.99999974E-6 : f32
    %41 = vector.broadcast %cst_25 : f32 to vector<1x128xf32>
    %42 = arith.addf %38, %41 : vector<1x128xf32>
    %43 = math.rsqrt %42 : vector<1x128xf32>
    %44 = vector.broadcast %43 : vector<1x128xf32> to vector<8x128xf32>
    %45 = arith.mulf %40, %44 : vector<8x128xf32>
    %c0_26 = arith.constant 0 : index
    %c0_27 = arith.constant 0 : index
    %46 = vector.load %arg9[%c0_26, %c0_27] : memref<1x128xf32, #tpu.memory_space<vmem>>, vector<1x128xf32>
    %47 = vector.broadcast %46 : vector<1x128xf32> to vector<8x128xf32>
    %48 = arith.mulf %45, %47 : vector<8x128xf32>
    %c0_28 = arith.constant 0 : index
    %c0_29 = arith.constant 0 : index
    %49 = vector.load %arg10[%c0_28, %c0_29] : memref<1x128xf32, #tpu.memory_space<vmem>>, vector<1x128xf32>
    %50 = vector.broadcast %49 : vector<1x128xf32> to vector<8x128xf32>
    %51 = arith.addf %48, %50 : vector<8x128xf32>
    %cst_30 = arith.constant 0.000000e+00 : f32
    %52 = vector.broadcast %cst_30 : f32 to vector<8x128xf32>
    %53 = arith.maximumf %51, %52 : vector<8x128xf32>
    %54 = arith.truncf %53 : vector<8x128xf32> to vector<8x128xbf16>
    %c0_31 = arith.constant 0 : index
    %c0_32 = arith.constant 0 : index
    %55 = vector.load %arg11[%c0_31, %c0_32] : memref<128x128xbf16, #tpu.memory_space<vmem>>, vector<128x128xbf16>
    %cst_33 = arith.constant dense<0.000000e+00> : vector<8x128xf32>
    %56 = tpu.matmul %54, %55, %cst_33 {dimension_numbers = #tpu.dot_dimension_numbers<[1], [0], [0], [1], [0, 0, 1, 1], [], []>} : vector<8x128xbf16>, vector<128x128xbf16>, vector<8x128xf32> -> vector<8x128xf32>
    %c0_34 = arith.constant 0 : index
    %c0_35 = arith.constant 0 : index
    %57 = vector.load %arg12[%c0_34, %c0_35] : memref<1x128xf32, #tpu.memory_space<vmem>>, vector<1x128xf32>
    %58 = vector.broadcast %57 : vector<1x128xf32> to vector<8x128xf32>
    %59 = arith.addf %56, %58 : vector<8x128xf32>
    %60 = arith.truncf %59 : vector<8x128xf32> to vector<8x128xbf16>
    %c0_36 = arith.constant 0 : index
    %c0_37 = arith.constant 0 : index
    %61 = vector.load %arg13[%c0_36, %c0_37] : memref<128x128xbf16, #tpu.memory_space<vmem>>, vector<128x128xbf16>
    %cst_38 = arith.constant dense<0.000000e+00> : vector<8x128xf32>
    %62 = tpu.matmul %60, %61, %cst_38 {dimension_numbers = #tpu.dot_dimension_numbers<[1], [0], [0], [1], [0, 0, 1, 1], [], []>} : vector<8x128xbf16>, vector<128x128xbf16>, vector<8x128xf32> -> vector<8x128xf32>
    %c0_39 = arith.constant 0 : index
    %c0_40 = arith.constant 0 : index
    %63 = vector.load %arg14[%c0_39, %c0_40] : memref<1x128xf32, #tpu.memory_space<vmem>>, vector<1x128xf32>
    %64 = vector.broadcast %63 : vector<1x128xf32> to vector<8x128xf32>
    %65 = arith.addf %62, %64 : vector<8x128xf32>
    %66 = vector.broadcast %17 : vector<8x1xf32> to vector<8x128xf32>
    %67 = arith.mulf %65, %66 : vector<8x128xf32>
    %cst_41 = arith.constant dense<0.000000e+00> : vector<128xf32>
    %68 = vector.multi_reduction <add>, %67, %cst_41 [0] : vector<8x128xf32> to vector<128xf32>
    %69 = vector.shape_cast %68 : vector<128xf32> to vector<1x128xf32>
    %cst_42 = arith.constant 5.000000e-01 : f32
    %70 = vector.broadcast %cst_42 : f32 to vector<1x128xf32>
    %71 = arith.mulf %69, %70 : vector<1x128xf32>
    %72 = vector.broadcast %71 : vector<1x128xf32> to vector<8x128xf32>
    %73 = arith.subf %65, %72 : vector<8x128xf32>
    %74 = vector.broadcast %17 : vector<8x1xf32> to vector<8x128xf32>
    %75 = arith.mulf %73, %74 : vector<8x128xf32>
    %76 = arith.mulf %75, %75 : vector<8x128xf32>
    %cst_43 = arith.constant dense<0.000000e+00> : vector<128xf32>
    %77 = vector.multi_reduction <add>, %76, %cst_43 [0] : vector<8x128xf32> to vector<128xf32>
    %78 = vector.shape_cast %77 : vector<128xf32> to vector<1x128xf32>
    %cst_44 = arith.constant 5.000000e-01 : f32
    %79 = vector.broadcast %cst_44 : f32 to vector<1x128xf32>
    %80 = arith.mulf %78, %79 : vector<1x128xf32>
    %81 = vector.broadcast %71 : vector<1x128xf32> to vector<8x128xf32>
    %82 = arith.subf %65, %81 : vector<8x128xf32>
    %cst_45 = arith.constant 9.99999974E-6 : f32
    %83 = vector.broadcast %cst_45 : f32 to vector<1x128xf32>
    %84 = arith.addf %80, %83 : vector<1x128xf32>
    %85 = math.rsqrt %84 : vector<1x128xf32>
    %86 = vector.broadcast %85 : vector<1x128xf32> to vector<8x128xf32>
    %87 = arith.mulf %82, %86 : vector<8x128xf32>
    %c0_46 = arith.constant 0 : index
    %c0_47 = arith.constant 0 : index
    %88 = vector.load %arg15[%c0_46, %c0_47] : memref<1x128xf32, #tpu.memory_space<vmem>>, vector<1x128xf32>
    %89 = vector.broadcast %88 : vector<1x128xf32> to vector<8x128xf32>
    %90 = arith.mulf %87, %89 : vector<8x128xf32>
    %c0_48 = arith.constant 0 : index
    %c0_49 = arith.constant 0 : index
    %91 = vector.load %arg16[%c0_48, %c0_49] : memref<1x128xf32, #tpu.memory_space<vmem>>, vector<1x128xf32>
    %92 = vector.broadcast %91 : vector<1x128xf32> to vector<8x128xf32>
    %93 = arith.addf %90, %92 : vector<8x128xf32>
    %cst_50 = arith.constant 0.000000e+00 : f32
    %94 = vector.broadcast %cst_50 : f32 to vector<8x128xf32>
    %95 = arith.maximumf %93, %94 : vector<8x128xf32>
    %96 = arith.truncf %95 : vector<8x128xf32> to vector<8x128xbf16>
    %c0_51 = arith.constant 0 : index
    %c0_52 = arith.constant 0 : index
    %97 = vector.load %arg17[%c0_51, %c0_52] : memref<128x128xbf16, #tpu.memory_space<vmem>>, vector<128x128xbf16>
    %cst_53 = arith.constant dense<0.000000e+00> : vector<8x128xf32>
    %98 = tpu.matmul %96, %97, %cst_53 {dimension_numbers = #tpu.dot_dimension_numbers<[1], [0], [0], [1], [0, 0, 1, 1], [], []>} : vector<8x128xbf16>, vector<128x128xbf16>, vector<8x128xf32> -> vector<8x128xf32>
    %c0_54 = arith.constant 0 : index
    %c0_55 = arith.constant 0 : index
    %99 = vector.load %arg18[%c0_54, %c0_55] : memref<1x128xf32, #tpu.memory_space<vmem>>, vector<1x128xf32>
    %100 = vector.broadcast %99 : vector<1x128xf32> to vector<8x128xf32>
    %101 = arith.addf %98, %100 : vector<8x128xf32>
    %c0_56 = arith.constant 0 : index
    %c0_57 = arith.constant 0 : index
    %102 = vector.load %arg19[%c0_56, %c0_57] : memref<8x128xf32, #tpu.memory_space<vmem>>, vector<8x128xf32>
    tpu.vector_store %arg19[%c0_56, %c0_57], %101 {strides = array<i32>} : memref<8x128xf32, #tpu.memory_space<vmem>>, vector<8x128xf32>,
    return
  }
}

</mosaic_0001>

<bundles_post_ra>
// kernel: tpu_custom_call.1
= control target key start
LH: loop header
LB: loop body
LE: loop exit
PB: predicated region body
PF: predicated region fallthrough
CT: control target
= control target key end

     0   :  { %s2721_s0 = inlined_call_operand.vmem [shape: bf16[512,36], index: 0, kind: input, shape index: {}]   ;;  %s2722_s1 = inlined_call_operand.hbm [shape: bf16[8,512], index: 1, kind: input, shape index: {}]   ;;  %s2723_s2 = inlined_call_operand.vmem [shape: f32[8,1], index: 2, kind: input, shape index: {}]   ;;  %s2724_s3 = inlined_call_operand.vmem [shape: bf16[36,128], index: 3, kind: input, shape index: {}]   ;;  %s2725_s4 = inlined_call_operand.vmem [shape: f32[1,128], index: 4, kind: input, shape index: {}]   ;;  %s2726_s5 = inlined_call_operand.vmem [shape: bf16[128,128], index: 5, kind: input, shape index: {}]   ;;  %s2727_s6 = inlined_call_operand.vmem [shape: f32[1,128], index: 6, kind: input, shape index: {}]   ;;  %s2728_s7 = inlined_call_operand.vmem [shape: bf16[128,128], index: 7, kind: input, shape index: {}]   ;;  %s2729_s8 = inlined_call_operand.vmem [shape: f32[1,128], index: 8, kind: input, shape index: {}]   ;;  %s2730_s9 = inlined_call_operand.vmem [shape: f32[1,128], index: 9, kind: input, shape index: {}]   ;;  %s2731_s10 = inlined_call_operand.vmem [shape: f32[1,128], index: 10, kind: input, shape index: {}]   ;;  %s2732_s11 = inlined_call_operand.vmem [shape: bf16[128,128], index: 11, kind: input, shape index: {}]   ;;  %s2733_s12 = inlined_call_operand.vmem [shape: f32[1,128], index: 12, kind: input, shape index: {}]   ;;  %s2734_s13 = inlined_call_operand.vmem [shape: bf16[128,128], index: 13, kind: input, shape index: {}]   ;;  %s2735_s14 = inlined_call_operand.vmem [shape: f32[1,128], index: 14, kind: input, shape index: {}]   ;;  %s2736_s15 = inlined_call_operand.vmem [shape: f32[1,128], index: 15, kind: input, shape index: {}]   ;;  %s2737_s16 = inlined_call_operand.vmem [shape: f32[1,128], index: 16, kind: input, shape index: {}]   ;;  %s2738_s17 = inlined_call_operand.vmem [shape: bf16[128,128], index: 17, kind: input, shape index: {}]   ;;  %s2739_s18 = inlined_call_operand.vmem [shape: f32[1,128], index: 18, kind: input, shape index: {}]   ;;  %s2740_s19 = inlined_call_operand.hbm [shape: f32[8,128], index: 19, kind: output, shape index: {}]  }
   0x1   :  { %2744 = sst [smem:[#allocation8_spill]] %s2721_s0 }
   0x2   :  { %2745 = sst [smem:[#allocation9_spill]] %s2722_s1 }
   0x3   :  { %2746 = sst [smem:[#allocation10_spill]] %s2723_s2 }
   0x4   :  { %2747 = sst [smem:[#allocation11_spill]] %s2724_s3 }
   0x5   :  { %24 = vsyncpa [#allocation3], 0 }
   0x6   :  { %25 = vsyncpa [#allocation4], 0  ;;  %s2120_s0 = smov [#allocation2]   ;;  %s2748_s1 = sld [smem:[#allocation9_spill]] }
   0x7   :  { %s34_s30 = sshll.u32 %s2120_s0, 4  ;;  %s35_s30 = int_to_ptr.vmem [resolvable:$true] %s34_s30 }
   0xc   :  { %s2072_s22 = scalar_lea.hbm %s2748_s1, 256 }
   0xd   :  { %p2073_p0 = scmp.ne.s32.totalorder %s2748_s1, %s2072_s22  ;;  %p2076_p1 = scmp.lt.u32.totalorder %s2072_s22, %s2748_s1 }
   0xf   :  { %p2078_p2 = pnand %p2076_p1, %p2073_p0 }
  0x11   :  { %2081 = shalt.err (!%p2078_p2)
}
  0x12   :  { %s2082_s3 = scalar_lea.vmem %s35_s30, 256  ;;  %p2087_p4 = scmp.lt.s32.totalorder %s35_s30, %s35_s30 }
  0x13   :  { %p2083_p3 = scmp.ne.s32.totalorder %s35_s30, %s2082_s3  ;;  %p2088_p5 = scmp.lt.s32.totalorder %s2082_s3, %s2082_s3 }
  0x15   :  { %p2089_p6 = por %p2088_p5, %p2087_p4 }
  0x17   :  { %p2090_p7 = pnand %p2089_p6, %p2083_p3 }
  0x19   :  { %2093 = shalt.err (!%p2090_p7)
}
  0x1a   :  { %37 = dma.hbm_to_vmem [thread:$0]  %s2748_s1, 256, %s35_s30, [#allocation3]  }
  0x1b   :  { %2116 = dma.done.wait [#allocation3], 256  }
  0x1c   :  { %2117 = vsyncadd [#allocation3], 4294967040  ;;  %s2749_s0 = sld [smem:[#allocation11_spill]]  ;;  %vm327_vm0 = vcmask 293888   ;;  %s2750_s25 = sld [smem:[#allocation8_spill]]  ;;  %vm424_vm1 = vcmask 1041408  }
  0x1d   :  { %v2374_v36 = vld [vmem:[#allocation2] sm:$0xff]  ;;  %vm2122_vm2 = vmmov 0  }
  0x1e   :  { %v1636_v37 = vcombine.high %v2374_v36, %v2374_v36  ;;  %v2381_v38 = vld [vmem:[%s2725_s4] ss:$0 sm:$0xff]  ;;  %s2751_s4 = sld [smem:[#allocation10_spill]] }
  0x20   :  { %861 = vmatprep.mubr.bf16.mxu1 %v1636_v37 }
  0x22   :  { %v1989_v0 = vld [vmem:[%s2749_s0] sm:$0xff]   ;;  %v1990_v1 = vld [vmem:[%s2749_s0 + $0x8] sm:$0xff]   ;;  %v1991_v2 = vld [vmem:[%s2749_s0 + $0x10] ss:$0 sps:$4 sm:$0x33]  }
  0x23   :  { %1812 = vmatprep.subr.bf16.mxu0 %v1989_v0  ;;  %v1992_v3 = vld [vmem:[%s2750_s25] sm:$0xff]   ;;  %v426_v4 = vsel %vm424_vm1, %v1991_v2, 0  ;;  %v1993_v5 = vld [vmem:[%s2750_s25 + $0x8] sm:$0xff]   ;;  %v1994_v6 = vld [vmem:[%s2750_s25 + $0x10] sm:$0xff]  }
  0x24   :  { %1813 = vmatpush3.bf16.msra.mxu0 %v1989_v0  ;;  %1818 = vmatprep.mubr.msk.bf16.mxu0 %vm327_vm0, %v1992_v3  ;;  %v1995_v7 = vld [vmem:[%s2750_s25 + $0x18] sm:$0xff]   ;;  %v1996_v8 = vld [vmem:[%s2750_s25 + $0x20] sm:$0xff]   ;;  %v1997_v9 = vld [vmem:[%s2750_s25 + $0x28] sm:$0xff]  }
  0x25   :  { %1814 = vmatprep.subr.bf16.mxu0 %v1990_v1  ;;  %v1998_v10 = vld [vmem:[%s2750_s25 + $0x30] sm:$0xff]   ;;  %v1999_v11 = vld [vmem:[%s2750_s25 + $0x38] sm:$0xff]   ;;  %v2000_v12 = vld [vmem:[%s2750_s25 + $0x40] sm:$0xff]  }
  0x26   :  { %v2001_v13 = vld [vmem:[%s2750_s25 + $0x48] sm:$0xff]   ;;  %v2002_v14 = vld [vmem:[%s2750_s25 + $0x50] sm:$0xff]   ;;  %v2003_v15 = vld [vmem:[%s2750_s25 + $0x58] sm:$0xff]  }
  0x27   :  { %v2004_v16 = vld [vmem:[%s2750_s25 + $0x60] sm:$0xff]   ;;  %v2005_v17 = vld [vmem:[%s2750_s25 + $0x68] sm:$0xff]   ;;  %v2006_v18 = vld [vmem:[%s2750_s25 + $0x70] sm:$0xff]  }
  0x28   :  { %1815 = vmatpush3.bf16.msra.mxu0 %v1990_v1  ;;  %v2007_v19 = vld [vmem:[%s2750_s25 + $0x78] sm:$0xff]   ;;  %v2008_v20 = vld [vmem:[%s2750_s25 + $0x80] sm:$0xff]   ;;  %v2009_v21 = vld [vmem:[%s2750_s25 + $0x88] sm:$0xff]  }
  0x29   :  { %1982 = vmatprep.subr.msk.bf16.mxu0 %vm424_vm1, %v1991_v2  ;;  %v2010_v22 = vld [vmem:[%s2750_s25 + $0x90] sm:$0xff]   ;;  %v2011_v23 = vld [vmem:[%s2750_s25 + $0x98] sm:$0xff]   ;;  %v2012_v24 = vld [vmem:[%s2750_s25 + $0xa0] sm:$0xff]  }
  0x2a   :  { %v2013_v25 = vld [vmem:[%s2750_s25 + $0xa8] sm:$0xff]   ;;  %v2014_v26 = vld [vmem:[%s2750_s25 + $0xb0] sm:$0xff]   ;;  %v2015_v27 = vld [vmem:[%s2750_s25 + $0xb8] sm:$0xff]  }
  0x2b   :  { %v2016_v28 = vld [vmem:[%s2750_s25 + $0xc0] sm:$0xff]   ;;  %v2017_v29 = vld [vmem:[%s2750_s25 + $0xc8] sm:$0xff]   ;;  %v2018_v30 = vld [vmem:[%s2750_s25 + $0xd0] sm:$0xff]  }
  0x2c   :  { %1817 = vmatpush3.bf16.msra.mxu0 %v426_v4  ;;  %v2019_v31 = vld [vmem:[%s2750_s25 + $0xd8] sm:$0xff]   ;;  %v2020_v32 = vld [vmem:[%s2750_s25 + $0xe0] sm:$0xff]   ;;  %v2021_v33 = vld [vmem:[%s2750_s25 + $0xe8] sm:$0xff]  }
  0x2d   :  { %v2022_v34 = vld [vmem:[%s2750_s25 + $0xf0] sm:$0xff]   ;;  %v2023_v35 = vld [vmem:[%s2750_s25 + $0xf8] sm:$0xff]  }
  0x2f   :  { %1819 = vmatmul.mubr.msk.bf16.vlgmr.msra.gmra.mrb[0].mxu0 %vm327_vm0, %v1993_v5 }
  0x30   :  { %1822 = vmatprep.mubr.msk.bf16.mxu0 %vm327_vm0, %v1994_v6 }
  0x37   :  { %1823 = vmatmul.mubr.msk.bf16.gmra.mrb[4].mxu0 %vm327_vm0, %v1995_v7 }
  0x38   :  { %1826 = vmatprep.mubr.msk.bf16.mxu0 %vm327_vm0, %v1996_v8 }
  0x3f   :  { %1827 = vmatmul.mubr.msk.bf16.gmra.mrb[8].mxu0 %vm327_vm0, %v1997_v9 }
  0x40   :  { %1830 = vmatprep.mubr.msk.bf16.mxu0 %vm327_vm0, %v1998_v10 }
  0x47   :  { %1831 = vmatmul.mubr.msk.bf16.gmra.mrb[12].mxu0 %vm327_vm0, %v1999_v11 }
  0x48   :  { %1834 = vmatprep.mubr.msk.bf16.mxu0 %vm327_vm0, %v2000_v12 }
  0x4f   :  { %1835 = vmatmul.mubr.msk.bf16.gmra.mrb[16].mxu0 %vm327_vm0, %v2001_v13 }
  0x50   :  { %1838 = vmatprep.mubr.msk.bf16.mxu0 %vm327_vm0, %v2002_v14 }
  0x57   :  { %1839 = vmatmul.mubr.msk.bf16.gmra.mrb[20].mxu0 %vm327_vm0, %v2003_v15 }
  0x58   :  { %1842 = vmatprep.mubr.msk.bf16.mxu0 %vm327_vm0, %v2004_v16 }
  0x5f   :  { %1843 = vmatmul.mubr.msk.bf16.gmra.mrb[24].mxu0 %vm327_vm0, %v2005_v17 }
  0x60   :  { %1846 = vmatprep.mubr.msk.bf16.mxu0 %vm327_vm0, %v2006_v18 }
  0x67   :  { %1847 = vmatmul.mubr.msk.bf16.gmra.mrb[28].mxu0 %vm327_vm0, %v2007_v19 }
  0x68   :  { %1850 = vmatprep.mubr.msk.bf16.mxu0 %vm327_vm0, %v2008_v20 }
  0x6f   :  { %1851 = vmatmul.mubr.msk.bf16.gmra.mrb[32].mxu0 %vm327_vm0, %v2009_v21 }
  0x70   :  { %1854 = vmatprep.mubr.msk.bf16.mxu0 %vm327_vm0, %v2010_v22 }
  0x77   :  { %1855 = vmatmul.mubr.msk.bf16.gmra.mrb[36].mxu0 %vm327_vm0, %v2011_v23 }
  0x78   :  { %1858 = vmatprep.mubr.msk.bf16.mxu0 %vm327_vm0, %v2012_v24 }
  0x7f   :  { %1859 = vmatmul.mubr.msk.bf16.gmra.mrb[40].mxu0 %vm327_vm0, %v2013_v25 }
  0x80   :  { %1862 = vmatprep.mubr.msk.bf16.mxu0 %vm327_vm0, %v2014_v26 }
  0x87   :  { %1863 = vmatmul.mubr.msk.bf16.gmra.mrb[44].mxu0 %vm327_vm0, %v2015_v27 }
  0x88   :  { %1866 = vmatprep.mubr.msk.bf16.mxu0 %vm327_vm0, %v2016_v28 }
  0x8f   :  { %1867 = vmatmul.mubr.msk.bf16.gmra.mrb[48].mxu0 %vm327_vm0, %v2017_v29 }
  0x90   :  { %1870 = vmatprep.mubr.msk.bf16.mxu0 %vm327_vm0, %v2018_v30 }
  0x97   :  { %1871 = vmatmul.mubr.msk.bf16.gmra.mrb[52].mxu0 %vm327_vm0, %v2019_v31 }
  0x98   :  { %1874 = vmatprep.mubr.msk.bf16.mxu0 %vm327_vm0, %v2020_v32 }
  0x9f   :  { %1875 = vmatmul.mubr.msk.bf16.gmra.mrb[56].mxu0 %vm327_vm0, %v2021_v33 }
  0xa0   :  { %1878 = vmatprep.mubr.msk.bf16.mxu0 %vm327_vm0, %v2022_v34 }
  0xa7   :  { %1879 = vmatmul.mubr.msk.bf16.gmra.mrb[60].mxu0 %vm327_vm0, %v2023_v35 }
 0x102   :  { %v1820_v39 = vpop.f32.mrb[0].mxu0 }
 0x103   :  { %v471_v40 = vadd.f32 %v1820_v39, %v2381_v38  ;;  %v462_v41 = vpop.f32.mrb[1].mxu0 }
 0x104   :  { %v463_v42 = vadd.f32 %v2381_v38, %v462_v41  ;;  %v1821_v43 = vpop.f32.mrb[2].mxu0 }
 0x105   :  { %v474_v44 = vadd.f32 %v1821_v43, %v2381_v38  ;;  %v465_v45 = vpop.f32.mrb[3].mxu0  ;;  %v719_v47 = vmax.f32 %v471_v40, 0.0 }
 0x106   :  { %v466_v46 = vadd.f32 %v2381_v38, %v465_v45  ;;  %v717_v49 = vmax.f32 %v463_v42, 0.0 }
 0x107   :  { %v720_v48 = vmax.f32 %v474_v44, 0.0 }
 0x108   :  { %v718_v50 = vmax.f32 %v466_v46, 0.0 }
 0x109   :  { %v2387_v51 = vpack.c.bf16 %v720_v48, %v719_v47 }
 0x10a   :  { %v1824_v52 = vpop.f32.mrb[4].mxu0  ;;  %v2389_v53 = vpack.c.bf16 %v718_v50, %v717_v49 }
 0x10b   :  { %v487_v54 = vadd.f32 %v1824_v52, %v2381_v38  ;;  %v478_v55 = vpop.f32.mrb[5].mxu0 }
 0x10c   :  { %v479_v56 = vadd.f32 %v2381_v38, %v478_v55  ;;  %v1825_v57 = vpop.f32.mrb[6].mxu0 }
 0x10d   :  { %v490_v58 = vadd.f32 %v1825_v57, %v2381_v38  ;;  %v481_v59 = vpop.f32.mrb[7].mxu0  ;;  %v723_v61 = vmax.f32 %v487_v54, 0.0 }
 0x10e   :  { %v482_v60 = vadd.f32 %v2381_v38, %v481_v59  ;;  %v721_v63 = vmax.f32 %v479_v56, 0.0 }
 0x10f   :  { %v724_v62 = vmax.f32 %v490_v58, 0.0 }
 0x110   :  { %v722_v0 = vmax.f32 %v482_v60, 0.0 }
 0x111   :  { %v2395_v1 = vpack.c.bf16 %v724_v62, %v723_v61 }
 0x112   :  { %v2397_v2 = vpack.c.bf16 %v722_v0, %v721_v63  ;;  %v1828_v3 = vpop.f32.mrb[8].mxu0 }
 0x113   :  { %v503_v4 = vadd.f32 %v1828_v3, %v2381_v38  ;;  %v494_v5 = vpop.f32.mrb[9].mxu0 }
 0x114   :  { %v495_v6 = vadd.f32 %v2381_v38, %v494_v5  ;;  %v1829_v7 = vpop.f32.mrb[10].mxu0 }
 0x115   :  { %v506_v8 = vadd.f32 %v1829_v7, %v2381_v38  ;;  %v497_v9 = vpop.f32.mrb[11].mxu0  ;;  %v727_v11 = vmax.f32 %v503_v4, 0.0 }
 0x116   :  { %v498_v10 = vadd.f32 %v2381_v38, %v497_v9  ;;  %v725_v13 = vmax.f32 %v495_v6, 0.0 }
 0x117   :  { %v728_v12 = vmax.f32 %v506_v8, 0.0 }
 0x118   :  { %v726_v14 = vmax.f32 %v498_v10, 0.0 }
 0x119   :  { %v2403_v15 = vpack.c.bf16 %v728_v12, %v727_v11 }
 0x11a   :  { %v2405_v16 = vpack.c.bf16 %v726_v14, %v725_v13  ;;  %v1832_v17 = vpop.f32.mrb[12].mxu0 }
 0x11b   :  { %v519_v18 = vadd.f32 %v1832_v17, %v2381_v38  ;;  %v510_v19 = vpop.f32.mrb[13].mxu0 }
 0x11c   :  { %v511_v20 = vadd.f32 %v2381_v38, %v510_v19  ;;  %v1833_v21 = vpop.f32.mrb[14].mxu0 }
 0x11d   :  { %v522_v22 = vadd.f32 %v1833_v21, %v2381_v38  ;;  %v513_v23 = vpop.f32.mrb[15].mxu0  ;;  %v731_v25 = vmax.f32 %v519_v18, 0.0 }
 0x11e   :  { %v514_v24 = vadd.f32 %v2381_v38, %v513_v23  ;;  %v729_v27 = vmax.f32 %v511_v20, 0.0 }
 0x11f   :  { %v732_v26 = vmax.f32 %v522_v22, 0.0 }
 0x120   :  { %v730_v28 = vmax.f32 %v514_v24, 0.0 }
 0x121   :  { %v2411_v29 = vpack.c.bf16 %v732_v26, %v731_v25 }
 0x122   :  { %v2413_v30 = vpack.c.bf16 %v730_v28, %v729_v27  ;;  %v1836_v31 = vpop.f32.mrb[16].mxu0 }
 0x123   :  { %v535_v32 = vadd.f32 %v1836_v31, %v2381_v38  ;;  %v526_v33 = vpop.f32.mrb[17].mxu0 }
 0x124   :  { %v527_v34 = vadd.f32 %v2381_v38, %v526_v33  ;;  %v1837_v35 = vpop.f32.mrb[18].mxu0 }
 0x125   :  { %v538_v37 = vadd.f32 %v1837_v35, %v2381_v38  ;;  %v529_v39 = vpop.f32.mrb[19].mxu0  ;;  %v735_v41 = vmax.f32 %v535_v32, 0.0 }
 0x126   :  { %v530_v40 = vadd.f32 %v2381_v38, %v529_v39  ;;  %v733_v43 = vmax.f32 %v527_v34, 0.0 }
 0x127   :  { %v736_v42 = vmax.f32 %v538_v37, 0.0  ;;  %v2442_v37 = vld [vmem:[#allocation2 + $0x8] sm:$0xff] }
 0x128   :  { %v734_v44 = vmax.f32 %v530_v40, 0.0 }
 0x129   :  { %v792_v45 = vpack.c.bf16 %v736_v42, %v735_v41  ;;  %v1635_v42 = vcombine.low %v2374_v36, %v2374_v36 }
 0x12a   :  { %v1840_v46 = vpop.f32.mrb[20].mxu0  ;;  %v791_v47 = vpack.c.bf16 %v734_v44, %v733_v43  ;;  %v1638_v44 = vcombine.high %v2442_v37, %v2442_v37 }
 0x12b   :  { %v551_v48 = vadd.f32 %v1840_v46, %v2381_v38  ;;  %v542_v49 = vpop.f32.mrb[21].mxu0 }
 0x12c   :  { %v543_v50 = vadd.f32 %v2381_v38, %v542_v49  ;;  %v1841_v52 = vpop.f32.mrb[22].mxu0  ;;  %1723 = vmatprep.subr.bf16.mxu1 %v791_v47 }
 0x12d   :  { %v554_v54 = vadd.f32 %v1841_v52, %v2381_v38  ;;  %v545_v55 = vpop.f32.mrb[23].mxu0  ;;  %1724 = vmatpush3.bf16.msra.mxu1 %v2389_v53  ;;  %v739_v57 = vmax.f32 %v551_v48, 0.0 }
 0x12e   :  { %v546_v56 = vadd.f32 %v2381_v38, %v545_v55  ;;  %1725 = vmatprep.subr.bf16.mxu1 %v792_v45  ;;  %v737_v59 = vmax.f32 %v543_v50, 0.0 }
 0x12f   :  { %v740_v58 = vmax.f32 %v554_v54, 0.0 }
 0x130   :  { %v738_v60 = vmax.f32 %v546_v56, 0.0 }
 0x131   :  { %v794_v61 = vpack.c.bf16 %v740_v58, %v739_v57  ;;  %1726 = vmatpush3.bf16.msra.mxu1 %v2387_v51 }
 0x132   :  { %v793_v62 = vpack.c.bf16 %v738_v60, %v737_v59  ;;  %v1844_v63 = vpop.f32.mrb[24].mxu0 }
 0x133   :  { %v567_v0 = vadd.f32 %v1844_v63, %v2381_v38  ;;  %v558_v3 = vpop.f32.mrb[25].mxu0 }
 0x134   :  { %v559_v4 = vadd.f32 %v2381_v38, %v558_v3  ;;  %v1845_v5 = vpop.f32.mrb[26].mxu0  ;;  %1727 = vmatprep.subr.bf16.mxu1 %v793_v62 }
 0x135   :  { %v570_v53 = vadd.f32 %v1845_v5, %v2381_v38  ;;  %v561_v6 = vpop.f32.mrb[27].mxu0  ;;  %1728 = vmatpush3.bf16.msra.mxu1 %v2397_v2  ;;  %v743_v8 = vmax.f32 %v567_v0, 0.0 }
 0x136   :  { %v562_v7 = vadd.f32 %v2381_v38, %v561_v6  ;;  %1729 = vmatprep.subr.bf16.mxu1 %v794_v61  ;;  %v741_v51 = vmax.f32 %v559_v4, 0.0 }
 0x137   :  { %v744_v9 = vmax.f32 %v570_v53, 0.0 }
 0x138   :  { %v742_v10 = vmax.f32 %v562_v7, 0.0 }
 0x139   :  { %v796_v11 = vpack.c.bf16 %v744_v9, %v743_v8  ;;  %1730 = vmatpush3.bf16.msra.mxu1 %v2395_v1 }
 0x13a   :  { %v795_v12 = vpack.c.bf16 %v742_v10, %v741_v51  ;;  %v1848_v13 = vpop.f32.mrb[28].mxu0 }
 0x13b   :  { %v583_v14 = vadd.f32 %v1848_v13, %v2381_v38  ;;  %v574_v17 = vpop.f32.mrb[29].mxu0 }
 0x13c   :  { %v575_v18 = vadd.f32 %v2381_v38, %v574_v17  ;;  %v1849_v19 = vpop.f32.mrb[30].mxu0  ;;  %1731 = vmatprep.subr.bf16.mxu1 %v795_v12 }
 0x13d   :  { %v586_v2 = vadd.f32 %v1849_v19, %v2381_v38  ;;  %v577_v20 = vpop.f32.mrb[31].mxu0  ;;  %1732 = vmatpush3.bf16.msra.mxu1 %v2405_v16  ;;  %v747_v22 = vmax.f32 %v583_v14, 0.0 }
 0x13e   :  { %v578_v21 = vadd.f32 %v2381_v38, %v577_v20  ;;  %1733 = vmatprep.subr.bf16.mxu1 %v796_v11  ;;  %v745_v1 = vmax.f32 %v575_v18, 0.0 }
 0x13f   :  { %v748_v23 = vmax.f32 %v586_v2, 0.0 }
 0x140   :  { %v746_v24 = vmax.f32 %v578_v21, 0.0 }
 0x141   :  { %v798_v25 = vpack.c.bf16 %v748_v23, %v747_v22  ;;  %1734 = vmatpush3.bf16.msra.mxu1 %v2403_v15 }
 0x142   :  { %v797_v26 = vpack.c.bf16 %v746_v24, %v745_v1  ;;  %v1852_v27 = vpop.f32.mrb[32].mxu0 }
 0x143   :  { %v599_v28 = vadd.f32 %v1852_v27, %v2381_v38  ;;  %v590_v31 = vpop.f32.mrb[33].mxu0 }
 0x144   :  { %v591_v32 = vadd.f32 %v2381_v38, %v590_v31  ;;  %v1853_v33 = vpop.f32.mrb[34].mxu0  ;;  %1735 = vmatprep.subr.bf16.mxu1 %v797_v26 }
 0x145   :  { %v602_v16 = vadd.f32 %v1853_v33, %v2381_v38  ;;  %v593_v34 = vpop.f32.mrb[35].mxu0  ;;  %1736 = vmatpush3.bf16.msra.mxu1 %v2413_v30  ;;  %v751_v15 = vmax.f32 %v599_v28, 0.0 }
 0x146   :  { %v594_v35 = vadd.f32 %v2381_v38, %v593_v34  ;;  %1737 = vmatprep.subr.bf16.mxu1 %v798_v25  ;;  %v749_v40 = vmax.f32 %v591_v32, 0.0 }
 0x147   :  { %v752_v39 = vmax.f32 %v602_v16, 0.0 }
 0x148   :  { %v750_v41 = vmax.f32 %v594_v35, 0.0 }
 0x149   :  { %v2446_v43 = vpack.c.bf16 %v752_v39, %v751_v15  ;;  %1738 = vmatpush3.bf16.msra.mxu1 %v2411_v29 }
 0x14a   :  { %v2451_v30 = vpack.c.bf16 %v750_v41, %v749_v40  ;;  %v1856_v45 = vpop.f32.mrb[36].mxu0 }
 0x14b   :  { %v615_v46 = vadd.f32 %v1856_v45, %v2381_v38  ;;  %v606_v47 = vpop.f32.mrb[37].mxu0 }
 0x14c   :  { %v607_v48 = vadd.f32 %v2381_v38, %v606_v47  ;;  %v1857_v49 = vpop.f32.mrb[38].mxu0  ;;  %862 = vmatmul.mubr.bf16.vlgmr.msra.gmra.mrb[0].mxu1 %v1635_v42 }
 0x14d   :  { %v618_v50 = vadd.f32 %v1857_v49, %v2381_v38  ;;  %v609_v36 = vpop.f32.mrb[39].mxu0  ;;  %901 = vmatprep.mubr.bf16.mxu1 %v1638_v44  ;;  %v755_v29 = vmax.f32 %v615_v46, 0.0 }
 0x14e   :  { %v610_v52 = vadd.f32 %v2381_v38, %v609_v36  ;;  %v753_v55 = vmax.f32 %v607_v48, 0.0 }
 0x14f   :  { %v756_v54 = vmax.f32 %v618_v50, 0.0 }
 0x150   :  { %v754_v56 = vmax.f32 %v610_v52, 0.0 }
 0x151   :  { %v2457_v57 = vpack.c.bf16 %v756_v54, %v755_v29 }
 0x152   :  { %v2459_v58 = vpack.c.bf16 %v754_v56, %v753_v55  ;;  %v1860_v59 = vpop.f32.mrb[40].mxu0 }
 0x153   :  { %v631_v60 = vadd.f32 %v1860_v59, %v2381_v38  ;;  %v622_v61 = vpop.f32.mrb[41].mxu0 }
 0x154   :  { %v623_v62 = vadd.f32 %v2381_v38, %v622_v61  ;;  %v1861_v63 = vpop.f32.mrb[42].mxu0 }
 0x155   :  { %v634_v0 = vadd.f32 %v1861_v63, %v2381_v38  ;;  %v625_v3 = vpop.f32.mrb[43].mxu0  ;;  %v759_v5 = vmax.f32 %v631_v60, 0.0 }
 0x156   :  { %v626_v4 = vadd.f32 %v2381_v38, %v625_v3  ;;  %v757_v6 = vmax.f32 %v623_v62, 0.0 }
 0x157   :  { %v760_v53 = vmax.f32 %v634_v0, 0.0 }
 0x158   :  { %v758_v7 = vmax.f32 %v626_v4, 0.0 }
 0x159   :  { %v2465_v8 = vpack.c.bf16 %v760_v53, %v759_v5 }
 0x15a   :  { %v2467_v9 = vpack.c.bf16 %v758_v7, %v757_v6  ;;  %v1864_v51 = vpop.f32.mrb[44].mxu0 }
 0x15b   :  { %v647_v10 = vadd.f32 %v1864_v51, %v2381_v38  ;;  %v638_v11 = vpop.f32.mrb[45].mxu0 }
 0x15c   :  { %v639_v12 = vadd.f32 %v2381_v38, %v638_v11  ;;  %v1865_v13 = vpop.f32.mrb[46].mxu0 }
 0x15d   :  { %v650_v14 = vadd.f32 %v1865_v13, %v2381_v38  ;;  %v641_v17 = vpop.f32.mrb[47].mxu0  ;;  %v763_v19 = vmax.f32 %v647_v10, 0.0 }
 0x15e   :  { %v642_v18 = vadd.f32 %v2381_v38, %v641_v17  ;;  %v761_v20 = vmax.f32 %v639_v12, 0.0 }
 0x15f   :  { %v764_v2 = vmax.f32 %v650_v14, 0.0 }
 0x160   :  { %v762_v21 = vmax.f32 %v642_v18, 0.0 }
 0x161   :  { %v2473_v22 = vpack.c.bf16 %v764_v2, %v763_v19 }
 0x162   :  { %v2475_v23 = vpack.c.bf16 %v762_v21, %v761_v20  ;;  %v1868_v1 = vpop.f32.mrb[48].mxu0  ;;  %v1637_v20 = vcombine.low %v2442_v37, %v2442_v37  ;;  %v2030_v37 = vld [vmem:[%s2726_s5 + $0x10] sm:$0xff]   ;;  %v2031_v21 = vld [vmem:[%s2726_s5 + $0x18] sm:$0xff]  }
 0x163   :  { %v663_v24 = vadd.f32 %v1868_v1, %v2381_v38  ;;  %v654_v25 = vpop.f32.mrb[49].mxu0  ;;  %v2034_v1 = vld [vmem:[%s2726_s5 + $0x30] sm:$0xff]  }
 0x164   :  { %v655_v26 = vadd.f32 %v2381_v38, %v654_v25  ;;  %v1869_v27 = vpop.f32.mrb[50].mxu0 }
 0x165   :  { %v666_v28 = vadd.f32 %v1869_v27, %v2381_v38  ;;  %v657_v31 = vpop.f32.mrb[51].mxu0  ;;  %v767_v33 = vmax.f32 %v663_v24, 0.0  ;;  %v2035_v24 = vld [vmem:[%s2726_s5 + $0x38] sm:$0xff]  }
 0x166   :  { %v658_v32 = vadd.f32 %v2381_v38, %v657_v31  ;;  %v765_v34 = vmax.f32 %v655_v26, 0.0 }
 0x167   :  { %v768_v16 = vmax.f32 %v666_v28, 0.0 }
 0x168   :  { %v766_v35 = vmax.f32 %v658_v32, 0.0 }
 0x169   :  { %v808_v15 = vpack.c.bf16 %v768_v16, %v767_v33 }
 0x16a   :  { %v807_v39 = vpack.c.bf16 %v766_v35, %v765_v34  ;;  %v1872_v40 = vpop.f32.mrb[52].mxu0 }
 0x16b   :  { %v679_v41 = vadd.f32 %v1872_v40, %v2381_v38  ;;  %v670_v42 = vpop.f32.mrb[53].mxu0 }
 0x16c   :  { %v671_v44 = vadd.f32 %v2381_v38, %v670_v42  ;;  %v1873_v45 = vpop.f32.mrb[54].mxu0  ;;  %1745 = vmatprep.subr.bf16.mxu1 %v807_v39  ;;  %v2036_v39 = vld [vmem:[%s2728_s7] sm:$0xff]   ;;  %v2038_v42 = vld [vmem:[%s2728_s7 + $0x10] sm:$0xff]  }
 0x16d   :  { %v682_v46 = vadd.f32 %v1873_v45, %v2381_v38  ;;  %v673_v47 = vpop.f32.mrb[55].mxu0  ;;  %1746 = vmatpush3.bf16.msra.mxu1 %v2451_v30  ;;  %v771_v49 = vmax.f32 %v679_v41, 0.0  ;;  %v2037_v41 = vld [vmem:[%s2728_s7 + $0x8] sm:$0xff]   ;;  %v2040_v45 = vld [vmem:[%s2728_s7 + $0x20] sm:$0xff]  }
 0x16e   :  { %v674_v48 = vadd.f32 %v2381_v38, %v673_v47  ;;  %1747 = vmatprep.subr.bf16.mxu1 %v808_v15  ;;  %v769_v36 = vmax.f32 %v671_v44, 0.0  ;;  %v2039_v44 = vld [vmem:[%s2728_s7 + $0x18] sm:$0xff]   ;;  %v2042_v47 = vld [vmem:[%s2728_s7 + $0x30] sm:$0xff]  }
 0x16f   :  { %v772_v50 = vmax.f32 %v682_v46, 0.0  ;;  %v2041_v46 = vld [vmem:[%s2728_s7 + $0x28] sm:$0xff]  }
 0x170   :  { %v770_v52 = vmax.f32 %v674_v48, 0.0  ;;  %v2043_v48 = vld [vmem:[%s2728_s7 + $0x38] sm:$0xff]  }
 0x171   :  { %v810_v29 = vpack.c.bf16 %v772_v50, %v771_v49  ;;  %1748 = vmatpush3.bf16.msra.mxu1 %v2446_v43  ;;  %v1021_v49 = vld [vmem:[%s2751_s4] sm:$0xff]  ;;  %s2124_s4 = smov [#allocation5]  }
 0x172   :  { %v809_v54 = vpack.c.bf16 %v770_v52, %v769_v36  ;;  %v1876_v55 = vpop.f32.mrb[56].mxu0  ;;  %v2044_v50 = vld [vmem:[%s2732_s11] sm:$0xff]   ;;  %v2123_v36 = vmov 0   ;;  %v2045_v52 = vld [vmem:[%s2732_s11 + $0x8] sm:$0xff]   ;;  %s1558_s25 = sshll.u32 %s2124_s4, 4  ;;  %s1559_s25 = int_to_ptr.vmem [resolvable:$true] %s1558_s25 }
 0x173   :  { %v695_v56 = vadd.f32 %v1876_v55, %v2381_v38  ;;  %v686_v59 = vpop.f32.mrb[57].mxu0  ;;  %1988 = vset.pattern.permute.xlu0 %v2123_v36  ;;  %v2048_v55 = vld [vmem:[%s2732_s11 + $0x20] sm:$0xff]   ;;  %p2099_p9 = scmp.lt.s32.totalorder %s1559_s25, %s1559_s25 }
 0x174   :  { %v687_v60 = vadd.f32 %v2381_v38, %v686_v59  ;;  %v1877_v61 = vpop.f32.mrb[58].mxu0  ;;  %1749 = vmatprep.subr.bf16.mxu1 %v809_v54  ;;  %1136 = vperm.xlu0 %1988, %v1021_v49   ;;  %v2047_v54 = vld [vmem:[%s2732_s11 + $0x18] sm:$0xff]  }
 0x175   :  { %v698_v30 = vadd.f32 %v1877_v61, %v2381_v38  ;;  %v689_v62 = vpop.f32.mrb[59].mxu0  ;;  %1750 = vmatpush3.bf16.msra.mxu1 %v2459_v58  ;;  %v775_v0 = vmax.f32 %v695_v56, 0.0  ;;  %v1639_v56 = vld [vmem:[%s2727_s6] ss:$0 sm:$0xff] }
 0x176   :  { %v690_v63 = vadd.f32 %v2381_v38, %v689_v62  ;;  %1751 = vmatprep.subr.bf16.mxu1 %v810_v29  ;;  %v773_v43 = vmax.f32 %v687_v60, 0.0  ;;  %v2046_v29 = vld [vmem:[%s2732_s11 + $0x10] sm:$0xff]  }
 0x177   :  { %v776_v3 = vmax.f32 %v698_v30, 0.0 }
 0x178   :  { %v774_v4 = vmax.f32 %v690_v63, 0.0 }
 0x179   :  { %v812_v5 = vpack.c.bf16 %v776_v3, %v775_v0  ;;  %1752 = vmatpush3.bf16.msra.mxu1 %v2457_v57  ;;  %v2049_v0 = vld [vmem:[%s2732_s11 + $0x28] sm:$0xff]   ;;  %v2050_v3 = vld [vmem:[%s2732_s11 + $0x30] sm:$0xff]  }
 0x17a   :  { %v811_v53 = vpack.c.bf16 %v774_v4, %v773_v43  ;;  %v1880_v6 = vpop.f32.mrb[60].mxu0  ;;  %v2051_v43 = vld [vmem:[%s2732_s11 + $0x38] sm:$0xff]   ;;  %v2052_v4 = vld [vmem:[%s2734_s13] sm:$0xff]  }
 0x17b   :  { %v711_v7 = vadd.f32 %v1880_v6, %v2381_v38  ;;  %v702_v51 = vpop.f32.mrb[61].mxu0  ;;  %v2055_v6 = vld [vmem:[%s2734_s13 + $0x18] sm:$0xff]  }
 0x17c   :  { %v703_v10 = vadd.f32 %v2381_v38, %v702_v51  ;;  %v1881_v11 = vpop.f32.mrb[62].mxu0  ;;  %1753 = vmatprep.subr.bf16.mxu1 %v811_v53  ;;  %v2054_v53 = vld [vmem:[%s2734_s13 + $0x10] sm:$0xff]   ;;  %v2057_v51 = vld [vmem:[%s2734_s13 + $0x28] sm:$0xff]  }
 0x17d   :  { %v714_v58 = vadd.f32 %v1881_v11, %v2381_v38  ;;  %v705_v12 = vpop.f32.mrb[63].mxu0  ;;  %1754 = vmatpush3.bf16.msra.mxu1 %v2467_v9  ;;  %v779_v14 = vmax.f32 %v711_v7, 0.0  ;;  %v2121_v9 = vmov 0.0   ;;  %v2056_v7 = vld [vmem:[%s2734_s13 + $0x20] sm:$0xff]  }
 0x17e   :  { %v706_v13 = vadd.f32 %v2381_v38, %v705_v12  ;;  %1755 = vmatprep.subr.bf16.mxu1 %v812_v5  ;;  %v777_v57 = vmax.f32 %v703_v10, 0.0  ;;  %v2028_v38 = vld [vmem:[%s2726_s5] sm:$0xff]   ;;  %1922 = vmatprep.subr.bf16.mxu0 %v2121_v9  ;;  %v2053_v5 = vld [vmem:[%s2734_s13 + $0x8] sm:$0xff]   ;;  %v2058_v10 = vld [vmem:[%s2734_s13 + $0x30] sm:$0xff]  }
 0x17f   :  { %v780_v17 = vmax.f32 %v714_v58, 0.0  ;;  %1938 = vmatprep.mubr.msk.bf16.mxu0 %vm2122_vm2, %v2121_v9  ;;  %1923 = vmatpush3.bf16.msra.mxu0 %v2044_v50  ;;  %v1648_v11 = vld [vmem:[%s2729_s8] ss:$0 sm:$0xff] }
 0x180   :  { %v778_v18 = vmax.f32 %v706_v13, 0.0  ;;  %1924 = vmatprep.subr.bf16.mxu0 %v2121_v9 }
 0x181   :  { %v814_v19 = vpack.c.bf16 %v780_v17, %v779_v14  ;;  %1756 = vmatpush3.bf16.msra.mxu1 %v2465_v8  ;;  %v2029_v8 = vld [vmem:[%s2726_s5 + $0x8] sm:$0xff]  }
 0x182   :  { %v813_v2 = vpack.c.bf16 %v778_v18, %v777_v57 }
 0x183   :  { %1925 = vmatpush3.bf16.msra.mxu0 %v2045_v52  ;;  %v2060_v52 = vld [vmem:[%s2738_s17] sm:$0xff]  }
 0x184   :  { %1757 = vmatprep.subr.bf16.mxu1 %v813_v2  ;;  %1926 = vmatprep.subr.bf16.mxu0 %v2121_v9 }
 0x185   :  { %1758 = vmatpush3.bf16.msra.mxu1 %v2475_v23  ;;  %v2033_v23 = vld [vmem:[%s2726_s5 + $0x28] sm:$0xff]  }
 0x186   :  { %1759 = vmatprep.subr.bf16.mxu1 %v814_v19 }
 0x187   :  { %1927 = vmatpush3.bf16.msra.mxu0 %v2046_v29  ;;  %v2061_v29 = vld [vmem:[%s2738_s17 + $0x8] sm:$0xff]  }
 0x188   :  { %1928 = vmatprep.subr.bf16.mxu0 %v2121_v9 }
 0x189   :  { %1760 = vmatpush3.bf16.msra.mxu1 %v2473_v22  ;;  %v2032_v22 = vld [vmem:[%s2726_s5 + $0x20] sm:$0xff]  }
 0x18a   :  { %1882 = vmatprep.subr.bf16.mxu1 %v2121_v9 }
 0x18b   :  { %1929 = vmatpush3.bf16.msra.mxu0 %v2047_v54  ;;  %v2062_v54 = vld [vmem:[%s2738_s17 + $0x10] sm:$0xff]  }
 0x18c   :  { %902 = vmatmul.mubr.bf16.vlgmr.msra.gmra.mrb[4].mxu1 %v1637_v20  ;;  %1930 = vmatprep.subr.bf16.mxu0 %v2121_v9 }
 0x18d   :  { %1883 = vmatpush3.bf16.msra.mxu1 %v2028_v38  ;;  %1898 = vmatprep.mubr.msk.bf16.mxu1 %vm2122_vm2, %v2121_v9 }
 0x18e   :  { %1884 = vmatprep.subr.bf16.mxu1 %v2121_v9 }
 0x18f   :  { %1931 = vmatpush3.bf16.msra.mxu0 %v2048_v55  ;;  %v2063_v55 = vld [vmem:[%s2738_s17 + $0x18] sm:$0xff]  }
 0x190   :  { %1932 = vmatprep.subr.bf16.mxu0 %v2121_v9 }
 0x191   :  { %1885 = vmatpush3.bf16.msra.mxu1 %v2029_v8 }
 0x192   :  { %1886 = vmatprep.subr.bf16.mxu1 %v2121_v9 }
 0x193   :  { %1933 = vmatpush3.bf16.msra.mxu0 %v2049_v0 }
 0x194   :  { %1934 = vmatprep.subr.bf16.mxu0 %v2121_v9 }
 0x195   :  { %1887 = vmatpush3.bf16.msra.mxu1 %v2030_v37 }
 0x196   :  { %1888 = vmatprep.subr.bf16.mxu1 %v2121_v9 }
 0x197   :  { %1935 = vmatpush3.bf16.msra.mxu0 %v2050_v3 }
 0x198   :  { %1936 = vmatprep.subr.bf16.mxu0 %v2121_v9 }
 0x199   :  { %1889 = vmatpush3.bf16.msra.mxu1 %v2031_v21 }
 0x19a   :  { %1890 = vmatprep.subr.bf16.mxu1 %v2121_v9 }
 0x19b   :  { %1937 = vmatpush3.bf16.msra.mxu0 %v2051_v43 }
 0x19c   :  { %1962 = vmatprep.subr.bf16.mxu0 %v2121_v9 }
 0x19d   :  { %1891 = vmatpush3.bf16.msra.mxu1 %v2032_v22 }
 0x19e   :  { %1892 = vmatprep.subr.bf16.mxu1 %v2121_v9 }
 0x1a1   :  { %1893 = vmatpush3.bf16.msra.mxu1 %v2033_v23 }
 0x1a2   :  { %1894 = vmatprep.subr.bf16.mxu1 %v2121_v9 }
 0x1a5   :  { %1895 = vmatpush3.bf16.msra.mxu1 %v2034_v1 }
 0x1a6   :  { %1896 = vmatprep.subr.bf16.mxu1 %v2121_v9 }
 0x1a9   :  { %1897 = vmatpush3.bf16.msra.mxu1 %v2035_v24 }
 0x1aa   :  { %1902 = vmatprep.subr.bf16.mxu1 %v2121_v9 }
 0x1f3   :  { %v2646_v12 = vpop.permute.xlu0 %1136 }
 0x21f   :  { %v1739_v25 = vpop.f32.mrb[0].mxu1 }
 0x220   :  { %v1740_v26 = vpop.f32.mrb[1].mxu1 }
 0x221   :  { %v1741_v27 = vadd.f32 %v1740_v26, %v1739_v25  ;;  %v1742_v28 = vpop.f32.mrb[2].mxu1 }
 0x222   :  { %v1743_v31 = vpop.f32.mrb[3].mxu1 }
 0x25f   :  { %v1761_v32 = vpop.f32.mrb[4].mxu1 }
 0x260   :  { %v1762_v33 = vpop.f32.mrb[5].mxu1 }
 0x261   :  { %v1763_v16 = vadd.f32 %v1762_v33, %v1761_v32  ;;  %v1764_v34 = vpop.f32.mrb[6].mxu1 }
 0x262   :  { %v1765_v35 = vpop.f32.mrb[7].mxu1  ;;  %v1657_v34 = vld [vmem:[%s2730_s9] ss:$0 sm:$0xff] }
 0x263   :  { %v904_v15 = vadd.f32 %v1763_v16, %v1741_v27 }
 0x265   :  { %v909_v40 = vpack.c.bf16 %v904_v15, %v904_v15  ;;  %v1658_v15 = vld [vmem:[%s2731_s10] ss:$0 sm:$0xff] }
 0x267   :  { %1899 = vmatmul.mubr.bf16.vlgmr.msra.gmra.mrb[8].mxu1 %v909_v40 }
 0x268   :  { %1903 = vmatpush3.bf16.msra.mxu1 %v2036_v39  ;;  %1918 = vmatprep.mubr.msk.bf16.mxu1 %vm2122_vm2, %v2121_v9 }
 0x269   :  { %1904 = vmatprep.subr.bf16.mxu1 %v2121_v9 }
 0x26c   :  { %1905 = vmatpush3.bf16.msra.mxu1 %v2037_v41 }
 0x26d   :  { %1906 = vmatprep.subr.bf16.mxu1 %v2121_v9 }
 0x270   :  { %1907 = vmatpush3.bf16.msra.mxu1 %v2038_v42 }
 0x271   :  { %1908 = vmatprep.subr.bf16.mxu1 %v2121_v9 }
 0x274   :  { %1909 = vmatpush3.bf16.msra.mxu1 %v2039_v44  ;;  %v2059_v44 = vld [vmem:[%s2734_s13 + $0x38] sm:$0xff]  }
 0x275   :  { %1910 = vmatprep.subr.bf16.mxu1 %v2121_v9 }
 0x278   :  { %1911 = vmatpush3.bf16.msra.mxu1 %v2040_v45  ;;  %v1659_v45 = vld [vmem:[%s2733_s12] ss:$0 sm:$0xff] }
 0x279   :  { %1912 = vmatprep.subr.bf16.mxu1 %v2121_v9 }
 0x27c   :  { %1913 = vmatpush3.bf16.msra.mxu1 %v2041_v46 }
 0x27d   :  { %1914 = vmatprep.subr.bf16.mxu1 %v2121_v9 }
 0x280   :  { %1915 = vmatpush3.bf16.msra.mxu1 %v2042_v47 }
 0x281   :  { %1916 = vmatprep.subr.bf16.mxu1 %v2121_v9 }
 0x284   :  { %1917 = vmatpush3.bf16.msra.mxu1 %v2043_v48 }
 0x285   :  { %1942 = vmatprep.subr.bf16.mxu1 %v2121_v9 }
 0x33a   :  { %v1015_v59 = vpop.f32.mrb[8].mxu1 }
 0x33b   :  { %v1016_v60 = vadd.f32 %v1639_v56, %v1015_v59  ;;  %v1900_v61 = vpop.f32.mrb[9].mxu1  ;;  %v2064_v56 = vld [vmem:[%s2738_s17 + $0x20] sm:$0xff]   ;;  %v2065_v59 = vld [vmem:[%s2738_s17 + $0x28] sm:$0xff]  }
 0x33c   :  { %v1018_v30 = vpop.f32.mrb[10].mxu1  ;;  %v2067_v61 = vld [vmem:[%s2738_s17 + $0x38] sm:$0xff]  }
 0x33d   :  { %v1022_v62 = vpack.c.bf16 %v1016_v60, %v1016_v60  ;;  %v1901_v63 = vpop.f32.mrb[11].mxu1  ;;  %v2066_v60 = vld [vmem:[%s2738_s17 + $0x30] sm:$0xff]   ;;  %v1668_v30 = vld [vmem:[%s2735_s14] ss:$0 sm:$0xff] }
 0x33f   :  { %1919 = vmatmul.mubr.bf16.vlgmr.msra.gmra.mrb[12].mxu1 %v1022_v62 }
 0x340   :  { %1958 = vmatprep.mubr.msk.bf16.mxu1 %vm2122_vm2, %v2121_v9  ;;  %1943 = vmatpush3.bf16.msra.mxu1 %v2052_v4 }
 0x341   :  { %1944 = vmatprep.subr.bf16.mxu1 %v2121_v9 }
 0x344   :  { %1945 = vmatpush3.bf16.msra.mxu1 %v2053_v5 }
 0x345   :  { %1946 = vmatprep.subr.bf16.mxu1 %v2121_v9 }
 0x348   :  { %1947 = vmatpush3.bf16.msra.mxu1 %v2054_v53 }
 0x349   :  { %1948 = vmatprep.subr.bf16.mxu1 %v2121_v9 }
 0x34c   :  { %1949 = vmatpush3.bf16.msra.mxu1 %v2055_v6 }
 0x34d   :  { %1950 = vmatprep.subr.bf16.mxu1 %v2121_v9 }
 0x350   :  { %1951 = vmatpush3.bf16.msra.mxu1 %v2056_v7 }
 0x351   :  { %1952 = vmatprep.subr.bf16.mxu1 %v2121_v9 }
 0x354   :  { %1953 = vmatpush3.bf16.msra.mxu1 %v2057_v51 }
 0x355   :  { %1954 = vmatprep.subr.bf16.mxu1 %v2121_v9 }
 0x358   :  { %1955 = vmatpush3.bf16.msra.mxu1 %v2058_v10 }
 0x359   :  { %1956 = vmatprep.subr.bf16.mxu1 %v2121_v9 }
 0x35c   :  { %1957 = vmatpush3.bf16.msra.mxu1 %v2059_v44 }
 0x412   :  { %v1128_v58 = vpop.f32.mrb[12].mxu1 }
 0x413   :  { %v1129_v13 = vadd.f32 %v1648_v11, %v1128_v58  ;;  %v1920_v14 = vpop.f32.mrb[13].mxu1 }
 0x414   :  { %v1131_v17 = vpop.f32.mrb[14].mxu1 }
 0x415   :  { %v1139_v57 = vmul.f32 %v2646_v12, %v1129_v13  ;;  %v1921_v18 = vpop.f32.mrb[15].mxu1 }
 0x417   :  { %v1140_v19 = vrot.slane %v1139_v57, 4 }
 0x419   :  { %v1141_v2 = vadd.f32 %v1140_v19, %v1139_v57 }
 0x41b   :  { %v1142_v20 = vrot.slane %v1141_v2, 2 }
 0x41d   :  { %v1143_v38 = vadd.f32 %v1142_v20, %v1141_v2 }
 0x41f   :  { %v1144_v8 = vrot.slane %v1143_v38, 1 }
 0x421   :  { %v1145_v37 = vadd.f32 %v1144_v8, %v1143_v38 }
 0x423   :  { %v1146_v21 = vmul.f32 0.5, %v1145_v37  ;;  %v1677_v37 = vld [vmem:[%s2736_s15] ss:$0 sm:$0xff]  ;;  %s2094_s15 = scalar_lea.vmem %s1559_s25, 128 }
 0x424   :  { %p2095_p8 = scmp.ne.s32.totalorder %s1559_s25, %s2094_s15  ;;  %p2100_p10 = scmp.lt.s32.totalorder %s2094_s15, %s2094_s15 }
 0x425   :  { %v1147_v22 = vsub.f32 %v1129_v13, %v1146_v21 }
 0x426   :  { %p2101_p11 = por %p2100_p10, %p2099_p9 }
 0x427   :  { %v1148_v23 = vmul.f32 %v1147_v22, %v2646_v12 }
 0x428   :  { %p2102_p12 = pnand %p2101_p11, %p2095_p8 }
 0x429   :  { %v1149_v1 = vmul.f32 %v1148_v23, %v1148_v23 }
 0x42b   :  { %v1150_v24 = vrot.slane %v1149_v1, 4 }
 0x42d   :  { %v1151_v25 = vadd.f32 %v1150_v24, %v1149_v1 }
 0x42f   :  { %v1152_v26 = vrot.slane %v1151_v25, 2 }
 0x431   :  { %v1153_v27 = vadd.f32 %v1152_v26, %v1151_v25  ;;  %v1679_v25 = vld [vmem:[%s2739_s18] ss:$0 sm:$0xff] }
 0x433   :  { %v1154_v28 = vrot.slane %v1153_v27, 1 }
 0x435   :  { %v1155_v31 = vadd.f32 %v1154_v28, %v1153_v27 }
 0x437   :  { %v1156_v32 = vmul.f32 0.5, %v1155_v31 }
 0x439   :  { %v1157_v33 = vadd.f32 1e-05, %v1156_v32 }
 0x43b   :  { %2068 = vrsqrt.f32 %v1157_v33 }
 0x445   :  { %v2069_v16 = vpop.eup %2068 }
 0x446   :  { %v1159_v35 = vmul.f32 %v2069_v16, %v1147_v22 }
 0x448   :  { %v1167_v39 = vmul.f32 %v1657_v34, %v1159_v35 }
 0x44a   :  { %v1175_v40 = vadd.f32 %v1658_v15, %v1167_v39 }
 0x44c   :  { %v1176_v41 = vmax.f32 %v1175_v40, 0.0 }
 0x44e   :  { %v1177_v42 = vpack.c.bf16 %v1176_v41, %v1176_v41 }
 0x450   :  { %1939 = vmatmul.mubr.bf16.vlgmr.msra.gmra.mrb[64].mxu0 %v1177_v42 }
 0x451   :  { %1978 = vmatprep.mubr.msk.bf16.mxu0 %vm2122_vm2, %v2121_v9  ;;  %1963 = vmatpush3.bf16.msra.mxu0 %v2060_v52 }
 0x452   :  { %1964 = vmatprep.subr.bf16.mxu0 %v2121_v9 }
 0x455   :  { %1965 = vmatpush3.bf16.msra.mxu0 %v2061_v29 }
 0x456   :  { %1966 = vmatprep.subr.bf16.mxu0 %v2121_v9 }
 0x459   :  { %1967 = vmatpush3.bf16.msra.mxu0 %v2062_v54 }
 0x45a   :  { %1968 = vmatprep.subr.bf16.mxu0 %v2121_v9 }
 0x45d   :  { %1969 = vmatpush3.bf16.msra.mxu0 %v2063_v55 }
 0x45e   :  { %1970 = vmatprep.subr.bf16.mxu0 %v2121_v9 }
 0x461   :  { %1971 = vmatpush3.bf16.msra.mxu0 %v2064_v56 }
 0x462   :  { %1972 = vmatprep.subr.bf16.mxu0 %v2121_v9 }
 0x465   :  { %1973 = vmatpush3.bf16.msra.mxu0 %v2065_v59 }
 0x466   :  { %1974 = vmatprep.subr.bf16.mxu0 %v2121_v9 }
 0x469   :  { %1975 = vmatpush3.bf16.msra.mxu0 %v2066_v60 }
 0x46a   :  { %1976 = vmatprep.subr.bf16.mxu0 %v2121_v9 }
 0x46d   :  { %1977 = vmatpush3.bf16.msra.mxu0 %v2067_v61 }
 0x523   :  { %v1283_v46 = vpop.f32.mrb[64].mxu0 }
 0x524   :  { %v1284_v47 = vadd.f32 %v1659_v45, %v1283_v46  ;;  %v1940_v48 = vpop.f32.mrb[65].mxu0 }
 0x525   :  { %v1286_v49 = vpop.f32.mrb[66].mxu0 }
 0x526   :  { %v1289_v50 = vpack.c.bf16 %v1284_v47, %v1284_v47  ;;  %v1941_v36 = vpop.f32.mrb[67].mxu0 }
 0x528   :  { %1959 = vmatmul.mubr.bf16.vlgmr.msra.gmra.mrb[16].mxu1 %v1289_v50 }
 0x5fb   :  { %v1395_v62 = vpop.f32.mrb[16].mxu1 }
 0x5fc   :  { %v1396_v63 = vadd.f32 %v1668_v30, %v1395_v62  ;;  %v1960_v0 = vpop.f32.mrb[17].mxu1 }
 0x5fd   :  { %v1398_v3 = vpop.f32.mrb[18].mxu1 }
 0x5fe   :  { %v1401_v43 = vmul.f32 %v1396_v63, %v2646_v12  ;;  %v1961_v4 = vpop.f32.mrb[19].mxu1 }
 0x600   :  { %v1402_v5 = vrot.slane %v1401_v43, 4 }
 0x602   :  { %v1403_v53 = vadd.f32 %v1402_v5, %v1401_v43 }
 0x604   :  { %v1404_v6 = vrot.slane %v1403_v53, 2 }
 0x606   :  { %v1405_v7 = vadd.f32 %v1404_v6, %v1403_v53 }
 0x608   :  { %v1406_v51 = vrot.slane %v1405_v7, 1 }
 0x60a   :  { %v1407_v10 = vadd.f32 %v1406_v51, %v1405_v7 }
 0x60c   :  { %v1408_v11 = vmul.f32 0.5, %v1407_v10 }
 0x60e   :  { %v1409_v9 = vsub.f32 %v1396_v63, %v1408_v11 }
 0x610   :  { %v1410_v58 = vmul.f32 %v1409_v9, %v2646_v12  ;;  %v1678_v12 = vld [vmem:[%s2737_s16] ss:$0 sm:$0xff] }
 0x612   :  { %v1411_v13 = vmul.f32 %v1410_v58, %v1410_v58 }
 0x614   :  { %v1412_v14 = vrot.slane %v1411_v13, 4 }
 0x616   :  { %v1413_v17 = vadd.f32 %v1412_v14, %v1411_v13 }
 0x618   :  { %v1414_v57 = vrot.slane %v1413_v17, 2 }
 0x61a   :  { %v1415_v18 = vadd.f32 %v1414_v57, %v1413_v17 }
 0x61c   :  { %v1416_v19 = vrot.slane %v1415_v18, 1 }
 0x61e   :  { %v1417_v2 = vadd.f32 %v1416_v19, %v1415_v18 }
 0x620   :  { %v1418_v20 = vmul.f32 0.5, %v1417_v2 }
 0x622   :  { %v1419_v38 = vadd.f32 1e-05, %v1418_v20 }
 0x624   :  { %2070 = vrsqrt.f32 %v1419_v38 }
 0x62e   :  { %v2071_v8 = vpop.eup %2070 }
 0x62f   :  { %v1421_v21 = vmul.f32 %v2071_v8, %v1409_v9 }
 0x631   :  { %v1429_v22 = vmul.f32 %v1677_v37, %v1421_v21 }
 0x633   :  { %v1437_v23 = vadd.f32 %v1678_v12, %v1429_v22 }
 0x635   :  { %v1438_v1 = vmax.f32 %v1437_v23, 0.0 }
 0x637   :  { %v1439_v24 = vpack.c.bf16 %v1438_v1, %v1438_v1 }
 0x639   :  { %1979 = vmatmul.mubr.bf16.vlgmr.msra.gmra.mrb[68].mxu0 %v1439_v24 }
 0x70c   :  { %v1545_v26 = vpop.f32.mrb[68].mxu0 }
 0x70d   :  { %v1546_v27 = vadd.f32 %v1679_v25, %v1545_v26  ;;  %v1980_v28 = vpop.f32.mrb[69].mxu0 }
 0x70e   :  { %v1548_v31 = vpop.f32.mrb[70].mxu0 }
 0x70f   :  { %1551 = vst [vmem:[#allocation5] sm:$0xff] %v1546_v27  ;;  %v1981_v32 = vpop.f32.mrb[71].mxu0 }
 0x710   :  { %2105 = shalt.err (!%p2102_p12)
}
 0x711   :  { %s2106_s18 = scalar_lea.hbm %s2740_s19, 128 }
 0x712   :  { %p2107_p13 = scmp.ne.s32.totalorder %s2740_s19, %s2106_s18  ;;  %p2110_p0 = scmp.lt.u32.totalorder %s2106_s18, %s2740_s19 }
 0x714   :  { %p2112_p1 = pnand %p2110_p0, %p2107_p13 }
 0x716   :  { %2115 = shalt.err (!%p2112_p1)
}
 0x717   :  { %1561 = dma.vmem_to_hbm [thread:$0]  %s1559_s25, 128, %s2740_s19, [#allocation4]  }
 0x718   :  { %2118 = dma.done.wait [#allocation4], 128  }
 0x719   :  { %2119 = vsyncadd [#allocation4], 4294967168 }
 0x71a   :  { %1565 = vsyncpa [#allocation3], 1 }
 0x71b   :  { %1566 = vsyncpa [#allocation4], 1 }

</bundles_post_ra>
